<compile_context>
chip_gen: v6e
topology: v6e:2x2x1
jax: 0.10.0
libtpu: 0.0.40
codegen_flags: <defaults>
</compile_context>

<pallas_src>
import jax
import jax.numpy as jnp
from jax.experimental import pallas as pl
from jax.experimental.pallas import tpu as pltpu


def _ensemble_matmul_kernel(x_ref, w_ref, b_ref, o_ref, acc_ref):
    # Grid = (row tiles, column tiles, H-reduction tiles); reduction is last.
    k = pl.program_id(2)

    @pl.when(k == 0)
    def _init():
        acc_ref[...] = jnp.zeros_like(acc_ref)

    acc_ref[...] += jnp.dot(
        x_ref[...], w_ref[...], preferred_element_type=jnp.float32
    )

    @pl.when(k == pl.num_programs(2) - 1)
    def _finalize():
        # bias is f32 (1, tn) and broadcasts over the (tm, tn) accumulator.
        o_ref[...] = (acc_ref[...] + b_ref[...]).astype(o_ref.dtype)


def _pick_tile(dim, preferred, gran):
    """Largest tile that is a multiple of `gran`, divides `dim` and is
    <= `preferred`.  Falls back to the full dimension (always a legal block)."""
    if dim <= preferred:
        return dim
    t = (preferred // gran) * gran
    while t >= gran:
        if dim % t == 0:
            return t
        t -= gran
    return dim


def ensemble_forward(x, w_stack, b_stack, *, compute_dtype=None,
                     preferred_tm=256, preferred_tn=512, preferred_tk=512):
    """x: [B, H], w_stack: [K, H, O], b_stack: [K, 1, O] -> [B, K*O]."""
    B, H = x.shape
    K, H2, O = w_stack.shape
    assert H2 == H, (H2, H)
    N = K * O

    out_dtype = x.dtype
    if compute_dtype is not None:
        # e.g. bf16: halves HBM bytes for the (dominant) weight stream and
        # doubles MXU rate on v6e/v7x; accumulation stays f32.
        x = x.astype(compute_dtype)
        w_stack = w_stack.astype(compute_dtype)

    # Fold the ensemble axis into the matmul N dimension.  concat(dim=1) is
    # then simply the column order of this single [H, K*O] weight matrix.
    w2 = jnp.transpose(w_stack, (1, 0, 2)).reshape(H, N)
    b2 = b_stack.reshape(1, N).astype(jnp.float32)

    tm = _pick_tile(B, preferred_tm, 8)      # batch tile
    tn = _pick_tile(N, preferred_tn, 128)    # output-column tile (lane dense)
    tk = _pick_tile(H, preferred_tk, 128)    # reduction tile

    x_bytes = jnp.dtype(x.dtype).itemsize
    w_bytes = jnp.dtype(w2.dtype).itemsize
    o_bytes = jnp.dtype(out_dtype).itemsize

    # VMEM budget: double-buffered x/W/out tiles + bias + f32 accumulator.
    est = (2 * tm * tk * x_bytes
           + 2 * tk * tn * w_bytes
           + 2 * tn * 4
           + tm * tn * 4
           + 2 * tm * tn * o_bytes)
    # >= default 32 MiB, but capped at 48 MiB so it is safe on every
    # generation (v7x has only 64 MiB physical VMEM per TensorCore).
    vmem_limit = int(min(48 * 2**20, max(32 * 2**20, 2 * est)))

    cost = pl.CostEstimate(
        flops=2 * B * H * N,
        transcendentals=0,
        bytes_accessed=B * H * x_bytes + H * N * w_bytes + N * 4 + B * N * o_bytes,
    )

    return pl.pallas_call(
        _ensemble_matmul_kernel,
        out_shape=jax.ShapeDtypeStruct((B, N), out_dtype),
        grid_spec=pltpu.PrefetchScalarGridSpec(
            num_scalar_prefetch=0,
            grid=(B // tm, N // tn, H // tk),
            in_specs=[
                pl.BlockSpec((tm, tk), lambda i, j, k: (i, k)),   # x row/red tile
                pl.BlockSpec((tk, tn), lambda i, j, k: (k, j)),   # fused W tile
                pl.BlockSpec((1, tn), lambda i, j, k: (0, j)),    # fused bias tile
            ],
            # Output tile (i, j): column block j covers the right slice of the
            # concatenated output -> torch.cat(dim=1) needs no extra copy.
            out_specs=pl.BlockSpec((tm, tn), lambda i, j, k: (i, j)),
            scratch_shapes=[pltpu.VMEM((tm, tn), jnp.float32)],
        ),
        compiler_params=pltpu.CompilerParams(
            dimension_semantics=("parallel", "parallel", "arbitrary"),
            vmem_limit_bytes=vmem_limit,
        ),
        cost_estimate=cost,
    )(x, w2, b2)


def reference_forward(x, w_stack, b_stack):
    # Pure-JAX reference mirroring the PyTorch module semantics.
    outs = [x @ w_stack[k] + b_stack[k, 0] for k in range(w_stack.shape[0])]
    return jnp.concatenate(outs, axis=1)


if __name__ == "__main__":
    # Small, deterministic example shapes consistent with the forward pass.
    B, H, O, K = 8, 128, 128, 3   # batch, hidden, per-model output, #members

    key = jax.random.PRNGKey(0)
    kx, kw, kb = jax.random.split(key, 3)

    x = jax.random.normal(kx, (B, H), dtype=jnp.float32)
    # Deterministic "sub-model" parameters (synthetic; not loaded from disk).
    w_stack = jax.random.normal(kw, (K, H, O), dtype=jnp.float32) * 0.02
    b_stack = jax.random.normal(kb, (K, 1, O), dtype=jnp.float32) * 0.01

    ref = reference_forward(x, w_stack, b_stack)

    # f32 path (bit-compatible with the PyTorch module semantics).
    out = jax.block_until_ready(ensemble_forward(x, w_stack, b_stack))
    assert out.shape == (B, K * O), out.shape
    assert jnp.allclose(out, ref, atol=1e-4, rtol=1e-4), "mismatch vs reference"

    # bf16 weight/activation streaming path (f32 accumulation on the MXU);
    # halves weight HBM bytes on this memory-bound workload.
    out_bf16 = jax.block_until_ready(
        ensemble_forward(x, w_stack, b_stack, compute_dtype=jnp.bfloat16))
    assert out_bf16.shape == (B, K * O), out_bf16.shape
    assert jnp.allclose(out_bf16.astype(jnp.float32), ref, atol=5e-2, rtol=5e-2), \
        "bf16 path mismatch vs reference"

    print("KERNEL_OK")
</pallas_src>

<mosaic_0001>
module attributes {stable_mosaic.version = 11 : i64} {
  func.func @_ensemble_matmul_kernel(%arg0: i32, %arg1: i32, %arg2: i32, %arg3: memref<8x128xf32, #tpu.memory_space<vmem>>, %arg4: memref<128x384xf32, #tpu.memory_space<vmem>>, %arg5: memref<1x384xf32, #tpu.memory_space<vmem>>, %arg6: memref<8x384xf32, #tpu.memory_space<vmem>>, %arg7: memref<8x384xf32, #tpu.memory_space<vmem>>) attributes {dimension_semantics = [#tpu.dimension_semantics<parallel>, #tpu.dimension_semantics<parallel>, #tpu.dimension_semantics<arbitrary>], iteration_bounds = array<i64: 1, 1, 1>, scalar_prefetch = 0 : i64, scratch_operands = 1 : i64, tpu.core_type = #tpu.core_type<tc>, window_params = [{transform_indices = @transform_0, window_bounds = array<i64: 8, 128>}, {transform_indices = @transform_1, window_bounds = array<i64: 128, 384>}, {transform_indices = @transform_2, window_bounds = array<i64: 1, 384>}, {transform_indices = @transform_3, window_bounds = array<i64: 8, 384>}]} {
    %c0_i32 = arith.constant 0 : i32
    %0 = arith.cmpi eq, %arg2, %c0_i32 : i32
    %1 = arith.extui %0 : i1 to i32
    %c0_i32_0 = arith.constant 0 : i32
    %2 = arith.cmpi ne, %1, %c0_i32_0 : i32
    scf.if %2 {
      %cst_10 = arith.constant 0.000000e+00 : f32
      %12 = vector.broadcast %cst_10 : f32 to vector<8x384xf32>
      %c0_11 = arith.constant 0 : index
      %c0_12 = arith.constant 0 : index
      %13 = vector.load %arg7[%c0_11, %c0_12] : memref<8x384xf32, #tpu.memory_space<vmem>>, vector<8x384xf32>
      tpu.vector_store %arg7[%c0_11, %c0_12], %12 {strides = array<i32>} : memref<8x384xf32, #tpu.memory_space<vmem>>, vector<8x384xf32>,
    } else {
    }
    %c0 = arith.constant 0 : index
    %c0_1 = arith.constant 0 : index
    %3 = vector.load %arg7[%c0, %c0_1] : memref<8x384xf32, #tpu.memory_space<vmem>>, vector<8x384xf32>
    %c0_2 = arith.constant 0 : index
    %c0_3 = arith.constant 0 : index
    %4 = vector.load %arg3[%c0_2, %c0_3] : memref<8x128xf32, #tpu.memory_space<vmem>>, vector<8x128xf32>
    %c0_4 = arith.constant 0 : index
    %c0_5 = arith.constant 0 : index
    %5 = vector.load %arg4[%c0_4, %c0_5] : memref<128x384xf32, #tpu.memory_space<vmem>>, vector<128x384xf32>
    %cst = arith.constant dense<0.000000e+00> : vector<8x384xf32>
    %6 = tpu.matmul %4, %5, %cst {dimension_numbers = #tpu.dot_dimension_numbers<[1], [0], [0], [1], [0, 0, 1, 1], [], []>} : vector<8x128xf32>, vector<128x384xf32>, vector<8x384xf32> -> vector<8x384xf32>
    %7 = arith.addf %3, %6 : vector<8x384xf32>
    %c0_6 = arith.constant 0 : index
    %c0_7 = arith.constant 0 : index
    %8 = vector.load %arg7[%c0_6, %c0_7] : memref<8x384xf32, #tpu.memory_space<vmem>>, vector<8x384xf32>
    tpu.vector_store %arg7[%c0_6, %c0_7], %7 {strides = array<i32>} : memref<8x384xf32, #tpu.memory_space<vmem>>, vector<8x384xf32>,
    %c0_i32_8 = arith.constant 0 : i32
    %9 = arith.cmpi eq, %arg2, %c0_i32_8 : i32
    %10 = arith.extui %9 : i1 to i32
    %c0_i32_9 = arith.constant 0 : i32
    %11 = arith.cmpi ne, %10, %c0_i32_9 : i32
    scf.if %11 {
      %c0_10 = arith.constant 0 : index
      %c0_11 = arith.constant 0 : index
      %12 = vector.load %arg7[%c0_10, %c0_11] : memref<8x384xf32, #tpu.memory_space<vmem>>, vector<8x384xf32>
      %c0_12 = arith.constant 0 : index
      %c0_13 = arith.constant 0 : index
      %13 = vector.load %arg5[%c0_12, %c0_13] : memref<1x384xf32, #tpu.memory_space<vmem>>, vector<1x384xf32>
      %14 = vector.broadcast %13 : vector<1x384xf32> to vector<8x384xf32>
      %15 = arith.addf %12, %14 : vector<8x384xf32>
      %c0_14 = arith.constant 0 : index
      %c0_15 = arith.constant 0 : index
      %16 = vector.load %arg6[%c0_14, %c0_15] : memref<8x384xf32, #tpu.memory_space<vmem>>, vector<8x384xf32>
      tpu.vector_store %arg6[%c0_14, %c0_15], %15 {strides = array<i32>} : memref<8x384xf32, #tpu.memory_space<vmem>>, vector<8x384xf32>,
    } else {
    }
    return
  }
  func.func @transform_0(%arg0: i32, %arg1: i32, %arg2: i32) -> (i32, i32) {
    %c0_i32 = arith.constant 0 : i32
    return %arg0, %arg2 : i32, i32
  }
  func.func @transform_1(%arg0: i32, %arg1: i32, %arg2: i32) -> (i32, i32) {
    %c0_i32 = arith.constant 0 : i32
    return %arg2, %arg1 : i32, i32
  }
  func.func @transform_2(%arg0: i32, %arg1: i32, %arg2: i32) -> (i32, i32) {
    %c0_i32 = arith.constant 0 : i32
    %c0_i32_0 = arith.constant 0 : i32
    return %c0_i32, %arg1 : i32, i32
  }
  func.func @transform_3(%arg0: i32, %arg1: i32, %arg2: i32) -> (i32, i32) {
    %c0_i32 = arith.constant 0 : i32
    return %arg0, %arg1 : i32, i32
  }
}

</mosaic_0001>

<bundles_post_ra>
// kernel: tpu_custom_call.1
= control target key start
LH: loop header
LB: loop body
LE: loop exit
PB: predicated region body
PF: predicated region fallthrough
CT: control target
= control target key end

     0   :  { %8 = vsyncpa [#allocation4], 0  ;;  %s474_s0 = inlined_call_operand.hbm [shape: f32[8,128], index: 0, kind: input, shape index: {}]   ;;  %s475_s1 = inlined_call_operand.hbm [shape: f32[128,384], index: 1, kind: input, shape index: {}]   ;;  %s476_s2 = inlined_call_operand.vmem [shape: f32[1,384], index: 2, kind: input, shape index: {}]   ;;  %s477_s3 = inlined_call_operand.hbm [shape: f32[8,384], index: 3, kind: output, shape index: {}]  }
   0x1   :  { %9 = vsyncpa [#allocation7], 0 }
   0x2   :  { %10 = vsyncpa [#allocation5], 0  ;;  %s417_s12 = smov [#allocation3]   ;;  %s418_s14 = smov [#allocation6]  }
   0x3   :  { %s17_s13 = sshll.u32 %s417_s12, 4  ;;  %s26_s15 = sshll.u32 %s418_s14, 4  ;;  %s18_s13 = int_to_ptr.vmem [resolvable:$true] %s17_s13  ;;  %s27_s15 = int_to_ptr.vmem [resolvable:$true] %s26_s15 }
   0x4   :  { %s359_s16 = scalar_lea.vmem %s18_s13, 128  ;;  %p364_p1 = scmp.lt.s32.totalorder %s18_s13, %s18_s13 }
   0x5   :  { %p360_p0 = scmp.ne.s32.totalorder %s18_s13, %s359_s16  ;;  %p365_p2 = scmp.lt.s32.totalorder %s359_s16, %s359_s16 }
   0x7   :  { %p366_p3 = por %p365_p2, %p364_p1 }
   0x9   :  { %p367_p4 = pnand %p366_p3, %p360_p0 }
   0xb   :  { %370 = shalt.err (!%p367_p4)
}
   0xc   :  { %20 = dma.hbm_to_vmem [thread:$0]  %s474_s0, 128, %s18_s13, [#allocation4]  }
   0xd   :  { %s379_s19 = scalar_lea.vmem %s27_s15, 6144  ;;  %p384_p6 = scmp.lt.s32.totalorder %s27_s15, %s27_s15 }
   0xe   :  { %p380_p5 = scmp.ne.s32.totalorder %s27_s15, %s379_s19  ;;  %p385_p7 = scmp.lt.s32.totalorder %s379_s19, %s379_s19 }
  0x10   :  { %p386_p8 = por %p385_p7, %p384_p6 }
  0x12   :  { %p387_p9 = pnand %p386_p8, %p380_p5 }
  0x14   :  { %390 = shalt.err (!%p387_p9)
}
  0x15   :  { %s419_s20 = smov 384   ;;  %s420_s21 = smov 24  }
  0x16   :  { %32 = dma.hbm_to_vmem [thread:$0]  %s475_s1, 6144, %s27_s15, [#allocation7], %s419_s20, %s419_s20, %s420_s21  }
  0x17   :  { %411 = dma.done.wait [#allocation4], 128  }
  0x18   :  { %412 = vsyncadd [#allocation4], 4294967168 }
  0x19   :  { %413 = dma.done.wait [#allocation7], 6144  }
  0x1a   :  { %414 = vsyncadd [#allocation7], 4294961152  ;;  %v421_v0 = vmov 0.0   ;;  %vm422_vm0 = vmmov 0   ;;  %v98_v1 = vld [vmem:[#allocation6 + $0x170] sm:$0xff]  ;;  %v97_v2 = vld [vmem:[#allocation6 + $0x168] sm:$0xff]  ;;  %v255_v50 = vlaneseq }
  0x1b   :  { %309 = vmatprep.subr.mxu1 %v421_v0  ;;  %164 = vmatprep.mubr.f32.mxu0 %v421_v0  ;;  %v99_v3 = vld [vmem:[#allocation6 + $0x178] sm:$0xff]  ;;  %v94_v5 = vld [vmem:[#allocation6 + $0x150] sm:$0xff]  ;;  %v96_v6 = vld [vmem:[#allocation6 + $0x160] sm:$0xff]  ;;  %s423_s24 = smov [#allocation8]  }
  0x1c   :  { %341 = vmatprep.mubr.msk.f32.mxu1 %vm422_vm0, %v421_v0  ;;  %100 = vmatprep.subr.mxu0 %v98_v1  ;;  %v95_v4 = vld [vmem:[#allocation6 + $0x158] sm:$0xff]  ;;  %v92_v7 = vld [vmem:[#allocation6 + $0x140] sm:$0xff]  ;;  %v93_v8 = vld [vmem:[#allocation6 + $0x148] sm:$0xff]  ;;  %v256_v51 = vshrl.u32 %v255_v50, 7  ;;  %s282_s25 = sshll.u32 %s423_s24, 4  ;;  %s283_s25 = int_to_ptr.vmem [resolvable:$true] %s282_s25 }
  0x1d   :  { %310 = vmatpush3.msra.mxu1 %v99_v3  ;;  %101 = vmatpush1.msra.mxu0 %v97_v2  ;;  %v91_v9 = vld [vmem:[#allocation6 + $0x138] sm:$0xff]  ;;  %v89_v10 = vld [vmem:[#allocation6 + $0x128] sm:$0xff]  ;;  %v90_v11 = vld [vmem:[#allocation6 + $0x130] sm:$0xff]  ;;  %s391_s26 = scalar_lea.vmem %s283_s25, 384  ;;  %p396_p11 = scmp.lt.s32.totalorder %s283_s25, %s283_s25 }
  0x1e   :  { %311 = vmatprep.subr.mxu1 %v421_v0  ;;  %102 = vmatprep.subr.mxu0 %v95_v4  ;;  %v88_v12 = vld [vmem:[#allocation6 + $0x120] sm:$0xff]  ;;  %v86_v13 = vld [vmem:[#allocation6 + $0x110] sm:$0xff]  ;;  %v87_v14 = vld [vmem:[#allocation6 + $0x118] sm:$0xff]  ;;  %v265_v52 = vsub.s32 2, %v256_v51  ;;  %v257_v53 = vsub.s32 0, %v256_v51  ;;  %v261_v55 = vsub.s32 1, %v256_v51  ;;  %p392_p10 = scmp.ne.s32.totalorder %s283_s25, %s391_s26  ;;  %p397_p12 = scmp.lt.s32.totalorder %s391_s26, %s391_s26 }
  0x1f   :  { %312 = vmatpush3.msra.mxu1 %v96_v6  ;;  %103 = vmatpush1.msra.mxu0 %v94_v5  ;;  %v85_v15 = vld [vmem:[#allocation6 + $0x108] sm:$0xff]  ;;  %v83_v16 = vld [vmem:[#allocation6 + $0xf8] sm:$0xff]  ;;  %v84_v17 = vld [vmem:[#allocation6 + $0x100] sm:$0xff] }
  0x20   :  { %313 = vmatprep.subr.mxu1 %v421_v0  ;;  %104 = vmatprep.subr.mxu0 %v92_v7  ;;  %v82_v18 = vld [vmem:[#allocation6 + $0xf0] sm:$0xff]  ;;  %v80_v19 = vld [vmem:[#allocation6 + $0xe0] sm:$0xff]  ;;  %v81_v20 = vld [vmem:[#allocation6 + $0xe8] sm:$0xff]  ;;  %p398_p13 = por %p397_p12, %p396_p11 }
  0x21   :  { %314 = vmatpush3.msra.mxu1 %v93_v8  ;;  %105 = vmatpush1.msra.mxu0 %v91_v9  ;;  %v79_v21 = vld [vmem:[#allocation6 + $0xd8] sm:$0xff]  ;;  %v77_v22 = vld [vmem:[#allocation6 + $0xc8] sm:$0xff]  ;;  %v78_v23 = vld [vmem:[#allocation6 + $0xd0] sm:$0xff] }
  0x22   :  { %315 = vmatprep.subr.mxu1 %v421_v0  ;;  %106 = vmatprep.subr.mxu0 %v89_v10  ;;  %v76_v24 = vld [vmem:[#allocation6 + $0xc0] sm:$0xff]  ;;  %v74_v25 = vld [vmem:[#allocation6 + $0xb0] sm:$0xff]  ;;  %v75_v26 = vld [vmem:[#allocation6 + $0xb8] sm:$0xff]  ;;  %p399_p0 = pnand %p398_p13, %p392_p10 }
  0x23   :  { %316 = vmatpush3.msra.mxu1 %v90_v11  ;;  %107 = vmatpush1.msra.mxu0 %v88_v12  ;;  %v73_v27 = vld [vmem:[#allocation6 + $0xa8] sm:$0xff]  ;;  %v71_v28 = vld [vmem:[#allocation6 + $0x98] sm:$0xff]  ;;  %v72_v29 = vld [vmem:[#allocation6 + $0xa0] sm:$0xff] }
  0x24   :  { %317 = vmatprep.subr.mxu1 %v421_v0  ;;  %108 = vmatprep.subr.mxu0 %v86_v13  ;;  %v70_v30 = vld [vmem:[#allocation6 + $0x90] sm:$0xff]  ;;  %v68_v31 = vld [vmem:[#allocation6 + $0x80] sm:$0xff]  ;;  %v69_v32 = vld [vmem:[#allocation6 + $0x88] sm:$0xff] }
  0x25   :  { %318 = vmatpush3.msra.mxu1 %v87_v14  ;;  %109 = vmatpush1.msra.mxu0 %v85_v15  ;;  %v67_v33 = vld [vmem:[#allocation6 + $0x78] sm:$0xff]  ;;  %v65_v34 = vld [vmem:[#allocation6 + $0x68] sm:$0xff]  ;;  %v66_v35 = vld [vmem:[#allocation6 + $0x70] sm:$0xff] }
  0x26   :  { %319 = vmatprep.subr.mxu1 %v421_v0  ;;  %110 = vmatprep.subr.mxu0 %v83_v16  ;;  %v64_v36 = vld [vmem:[#allocation6 + $0x60] sm:$0xff]  ;;  %v62_v37 = vld [vmem:[#allocation6 + $0x50] sm:$0xff]  ;;  %v63_v38 = vld [vmem:[#allocation6 + $0x58] sm:$0xff] }
  0x27   :  { %320 = vmatpush3.msra.mxu1 %v84_v17  ;;  %111 = vmatpush1.msra.mxu0 %v82_v18  ;;  %v61_v39 = vld [vmem:[#allocation6 + $0x48] sm:$0xff]  ;;  %v59_v40 = vld [vmem:[#allocation6 + $0x38] sm:$0xff]  ;;  %v60_v41 = vld [vmem:[#allocation6 + $0x40] sm:$0xff] }
  0x28   :  { %321 = vmatprep.subr.mxu1 %v421_v0  ;;  %112 = vmatprep.subr.mxu0 %v80_v19  ;;  %v58_v42 = vld [vmem:[#allocation6 + $0x30] sm:$0xff]  ;;  %v56_v43 = vld [vmem:[#allocation6 + $0x20] sm:$0xff]  ;;  %v57_v44 = vld [vmem:[#allocation6 + $0x28] sm:$0xff] }
  0x29   :  { %322 = vmatpush3.msra.mxu1 %v81_v20  ;;  %113 = vmatpush1.msra.mxu0 %v79_v21  ;;  %v55_v45 = vld [vmem:[#allocation6 + $0x18] sm:$0xff]  ;;  %v53_v46 = vld [vmem:[#allocation6 + $0x8] sm:$0xff]  ;;  %v54_v47 = vld [vmem:[#allocation6 + $0x10] sm:$0xff] }
  0x2a   :  { %323 = vmatprep.subr.mxu1 %v421_v0  ;;  %114 = vmatprep.subr.mxu0 %v77_v22  ;;  %v52_v48 = vld [vmem:[#allocation6] sm:$0xff]  ;;  %v51_v49 = vld [vmem:[#allocation3] sm:$0xff] }
  0x2b   :  { %324 = vmatpush3.msra.mxu1 %v78_v23  ;;  %115 = vmatpush1.msra.mxu0 %v76_v24  ;;  %v253_v54 = vld [vmem:[%s476_s2] sm:$0x7] }
  0x2c   :  { %325 = vmatprep.subr.mxu1 %v421_v0  ;;  %116 = vmatprep.subr.mxu0 %v74_v25  ;;  %v266_v56 = vrot.slane %v253_v54, %v265_v52  ;;  %v258_v57 = vrot.slane %v253_v54, %v257_v53  ;;  %v262_v59 = vrot.slane %v253_v54, %v261_v55 }
  0x2d   :  { %326 = vmatpush3.msra.mxu1 %v75_v26  ;;  %117 = vmatpush1.msra.mxu0 %v73_v27 }
  0x2e   :  { %327 = vmatprep.subr.mxu1 %v421_v0  ;;  %118 = vmatprep.subr.mxu0 %v71_v28 }
  0x2f   :  { %328 = vmatpush3.msra.mxu1 %v72_v29  ;;  %119 = vmatpush1.msra.mxu0 %v70_v30 }
  0x30   :  { %329 = vmatprep.subr.mxu1 %v421_v0  ;;  %120 = vmatprep.subr.mxu0 %v68_v31 }
  0x31   :  { %330 = vmatpush3.msra.mxu1 %v69_v32  ;;  %121 = vmatpush1.msra.mxu0 %v67_v33 }
  0x32   :  { %331 = vmatprep.subr.mxu1 %v421_v0  ;;  %122 = vmatprep.subr.mxu0 %v65_v34 }
  0x33   :  { %332 = vmatpush3.msra.mxu1 %v66_v35  ;;  %123 = vmatpush1.msra.mxu0 %v64_v36 }
  0x34   :  { %333 = vmatprep.subr.mxu1 %v421_v0  ;;  %124 = vmatprep.subr.mxu0 %v62_v37 }
  0x35   :  { %334 = vmatpush3.msra.mxu1 %v63_v38  ;;  %125 = vmatpush1.msra.mxu0 %v61_v39 }
  0x36   :  { %335 = vmatprep.subr.mxu1 %v421_v0  ;;  %126 = vmatprep.subr.mxu0 %v59_v40 }
  0x37   :  { %336 = vmatpush3.msra.mxu1 %v60_v41  ;;  %127 = vmatpush1.msra.mxu0 %v58_v42 }
  0x38   :  { %337 = vmatprep.subr.mxu1 %v421_v0  ;;  %128 = vmatprep.subr.mxu0 %v56_v43 }
  0x39   :  { %338 = vmatpush3.msra.mxu1 %v57_v44  ;;  %129 = vmatpush1.msra.mxu0 %v55_v45 }
  0x3a   :  { %339 = vmatprep.subr.mxu1 %v421_v0  ;;  %130 = vmatprep.subr.mxu0 %v53_v46 }
  0x3b   :  { %340 = vmatpush3.msra.mxu1 %v54_v47  ;;  %131 = vmatpush1.msra.mxu0 %v52_v48 }
  0x3c   :  { %342 = vmatmul.mubr.f32.vlgmr.msra.gmra.mxu1 %v51_v49  ;;  %165 = vmatmul.mubr.f32.vlgmr.msra.gmra.mxu0 %v51_v49 }
  0xfc   :  { %v237_v58 = vpop.f32.mrf.mxu1  ;;  %v166_v60 = vpop.f32.mrf.mxu0 }
  0xfd   :  { %v272_v61 = vadd.f32 %v266_v56, %v237_v58  ;;  %v270_v62 = vadd.f32 %v258_v57, %v166_v60 }
  0xfe   :  { %v343_v63 = vpop.f32.mrf.mxu1  ;;  %v168_v0 = vpop.f32.mrf.mxu0 }
  0xff   :  { %275 = vst [vmem:[#allocation8 + $0x10] sm:$0xff] %v272_v61  ;;  %273 = vst [vmem:[#allocation8] sm:$0xff] %v270_v62  ;;  %v271_v1 = vadd.f32 %v262_v59, %v168_v0 }
 0x101   :  { %274 = vst [vmem:[#allocation8 + $0x8] sm:$0xff] %v271_v1 }
 0x102   :  { %402 = shalt.err (!%p399_p0)
}
 0x103   :  { %285 = dma.vmem_to_hbm [thread:$0]  %s283_s25, 384, %s477_s3, [#allocation5]  }
 0x104   :  { %415 = dma.done.wait [#allocation5], 384  }
 0x105   :  { %416 = vsyncadd [#allocation5], 4294966912 }
 0x106   :  { %289 = vsyncpa [#allocation4], 1 }
 0x107   :  { %290 = vsyncpa [#allocation7], 1 }
 0x108   :  { %291 = vsyncpa [#allocation5], 1 }

</bundles_post_ra>
